<compile_context>
chip_gen: v6e
topology: v6e:2x2x1
jax: 0.10.0
libtpu: 0.0.40
codegen_flags: <defaults>
</compile_context>

<pallas_src>
import math

import jax
import jax.numpy as jnp
from jax.experimental import pallas as pl
from jax.experimental.pallas import tpu as pltpu

NSTYLE = 5        # nstyle
HIDDEN = 32       # hiden_size (small for the example; module default is 64)
BATCH = 256       # demo batch (2 grid steps -> both v7x TensorCores busy)
TB = 128          # batch tile on the lane axis (multiple of 128)
BN_EPS = 1e-5
SWISH_BETA_INIT = 4.0 * 1.0 - 1.0   # init=1.0 -> beta param = 3.0


def _disc_fc_kernel(x_ref, w0_ref, b0_ref, a0_ref,
                    w1_ref, b1_ref, a1_ref,
                    w2_ref, b2_ref, o_ref):
    f32 = jnp.float32
    x = x_ref[...]                                              # [NSTYLE, TB]

    # Linear(nstyle -> H): [H, NSTYLE] @ [NSTYLE, TB] -> [H, TB]
    h = jnp.dot(w0_ref[...], x, preferred_element_type=f32) + b0_ref[...]
    # Swish with precomputed a0 = 1 + beta  (BN eval scale folded into w1)
    h = h * jax.nn.sigmoid(a0_ref[...] * h)

    # Linear(H -> H), bn_scale pre-folded on the input side of w1
    h = jnp.dot(w1_ref[...], h, preferred_element_type=f32) + b1_ref[...]
    h = h * jax.nn.sigmoid(a1_ref[...] * h)

    # Linear(H -> 1), bn_scale pre-folded into w2: [1, H] @ [H, TB] -> [1, TB]
    out = jnp.dot(w2_ref[...], h, preferred_element_type=f32) + b2_ref[...]
    o_ref[...] = out.astype(o_ref.dtype)        # lane-dense (TB-wide) store


def discriminator_fc_forward(x, params, beta=None, *, tb=TB):
    """Forward pass of DiscriminatorFC (eval mode). `beta` is the GRL scale,
    which is an identity in the forward pass, so it is ignored here."""
    del beta  # forward-pass identity (only used by the backward of GRL)
    B, ns = x.shape
    H = params["w0"].shape[1]

    # --- one-time wrapper-side layout + constant folding -------------------
    bn_scale = jnp.float32(1.0 / math.sqrt(1.0 + BN_EPS))
    x_t = x.T.astype(jnp.float32)                       # [NSTYLE, B]
    Bp = pl.cdiv(B, tb) * tb
    if Bp != B:                                         # pad ragged batch
        x_t = jnp.pad(x_t, ((0, 0), (0, Bp - B)))

    w0_t = params["w0"].T.astype(jnp.float32)                  # [H, NSTYLE]
    b0_c = params["b0"].reshape(H, 1).astype(jnp.float32)
    a0_c = (1.0 + params["sb0"]).reshape(H, 1).astype(jnp.float32)
    w1_s = (params["w1"].T * bn_scale).astype(jnp.float32)     # [H, H]
    b1_c = params["b1"].reshape(H, 1).astype(jnp.float32)
    a1_c = (1.0 + params["sb1"]).reshape(H, 1).astype(jnp.float32)
    w2_s = (params["w2"].T * bn_scale).astype(jnp.float32)     # [1, H]
    b2_c = params["b2"].reshape(1, 1).astype(jnp.float32)

    grid = (Bp // tb,)
    in_specs = [
        pl.BlockSpec((ns, tb), lambda i: (0, i)),   # x, tiled over batch lanes
        pl.BlockSpec((H, ns), lambda i: (0, 0)),    # w0^T
        pl.BlockSpec((H, 1), lambda i: (0, 0)),     # b0
        pl.BlockSpec((H, 1), lambda i: (0, 0)),     # 1 + swish beta 0
        pl.BlockSpec((H, H), lambda i: (0, 0)),     # bn_scale * w1^T
        pl.BlockSpec((H, 1), lambda i: (0, 0)),     # b1
        pl.BlockSpec((H, 1), lambda i: (0, 0)),     # 1 + swish beta 1
        pl.BlockSpec((1, H), lambda i: (0, 0)),     # bn_scale * w2^T
        pl.BlockSpec((1, 1), lambda i: (0, 0)),     # b2
    ]
    out_specs = pl.BlockSpec((1, tb), lambda i: (0, i))   # lane-dense output

    out_t = pl.pallas_call(
        _disc_fc_kernel,
        out_shape=jax.ShapeDtypeStruct((1, Bp), jnp.float32),
        grid=grid,
        in_specs=in_specs,
        out_specs=out_specs,
        compiler_params=pltpu.CompilerParams(
            dimension_semantics=("parallel",)),
    )(x_t, w0_t, b0_c, a0_c, w1_s, b1_c, a1_c, w2_s, b2_c)

    return out_t[0, :B].reshape(B, 1)


def init_params(key, nstyle=NSTYLE, hidden=HIDDEN):
    """Deterministic synthetic init (PyTorch Linear-style uniform bounds).
    Weights stored [in_features, out_features] (PyTorch Linear convention
    transposed), biases / swish betas as [1, out_features]."""
    def linear(k, fan_in, fan_out):
        bound = 1.0 / math.sqrt(fan_in)
        kw, kb = jax.random.split(k)
        w = jax.random.uniform(kw, (fan_in, fan_out), jnp.float32, -bound, bound)
        b = jax.random.uniform(kb, (1, fan_out), jnp.float32, -bound, bound)
        return w, b

    k0, k1, k2 = jax.random.split(key, 3)
    w0, b0 = linear(k0, nstyle, hidden)
    w1, b1 = linear(k1, hidden, hidden)
    w2, b2 = linear(k2, hidden, 1)
    sb0 = jnp.full((1, hidden), SWISH_BETA_INIT, jnp.float32)
    sb1 = jnp.full((1, hidden), SWISH_BETA_INIT, jnp.float32)
    return dict(w0=w0, b0=b0, sb0=sb0, w1=w1, b1=b1, sb1=sb1, w2=w2, b2=b2)


def reference_forward(x, params):
    """Pure-JAX reference for validation (same eval-mode semantics,
    original un-folded formulation)."""
    bn_scale = 1.0 / math.sqrt(1.0 + BN_EPS)
    h = x @ params["w0"] + params["b0"]
    h = h * jax.nn.sigmoid((1.0 + params["sb0"]) * h)
    h = h * bn_scale
    h = h @ params["w1"] + params["b1"]
    h = h * jax.nn.sigmoid((1.0 + params["sb1"]) * h)
    h = h * bn_scale
    return h @ params["w2"] + params["b2"]


if __name__ == "__main__":
    key = jax.random.PRNGKey(0)
    kx, kp = jax.random.split(key)
    x = jax.random.normal(kx, (BATCH, NSTYLE), dtype=jnp.float32)
    params = init_params(kp)

    out = discriminator_fc_forward(x, params, beta=1.0)
    out = jax.block_until_ready(out)

    ref = reference_forward(x, params)
    assert out.shape == (BATCH, 1)
    assert jnp.allclose(out, ref, atol=1e-4, rtol=1e-5), (out, ref)
    print("KERNEL_OK")
</pallas_src>

<mosaic_0001>
module attributes {stable_mosaic.version = 11 : i64} {
  func.func @_disc_fc_kernel(%arg0: i32, %arg1: memref<5x128xf32, #tpu.memory_space<vmem>>, %arg2: memref<32x5xf32, #tpu.memory_space<vmem>>, %arg3: memref<32x1xf32, #tpu.memory_space<vmem>>, %arg4: memref<32x1xf32, #tpu.memory_space<vmem>>, %arg5: memref<32x32xf32, #tpu.memory_space<vmem>>, %arg6: memref<32x1xf32, #tpu.memory_space<vmem>>, %arg7: memref<32x1xf32, #tpu.memory_space<vmem>>, %arg8: memref<1x32xf32, #tpu.memory_space<vmem>>, %arg9: memref<1x1xf32, #tpu.memory_space<vmem>>, %arg10: memref<1x128xf32, #tpu.memory_space<vmem>>) attributes {dimension_semantics = [#tpu.dimension_semantics<parallel>], iteration_bounds = array<i64: 2>, scalar_prefetch = 0 : i64, scratch_operands = 0 : i64, tpu.core_type = #tpu.core_type<tc>, window_params = [{transform_indices = @transform_0, window_bounds = array<i64: 5, 128>}, {pipeline_mode = #tpu.pipeline_mode<synchronous>, transform_indices = @transform_1, window_bounds = array<i64: 32, 5>}, {pipeline_mode = #tpu.pipeline_mode<synchronous>, transform_indices = @transform_2, window_bounds = array<i64: 32, 1>}, {pipeline_mode = #tpu.pipeline_mode<synchronous>, transform_indices = @transform_3, window_bounds = array<i64: 32, 1>}, {pipeline_mode = #tpu.pipeline_mode<synchronous>, transform_indices = @transform_4, window_bounds = array<i64: 32, 32>}, {pipeline_mode = #tpu.pipeline_mode<synchronous>, transform_indices = @transform_5, window_bounds = array<i64: 32, 1>}, {pipeline_mode = #tpu.pipeline_mode<synchronous>, transform_indices = @transform_6, window_bounds = array<i64: 32, 1>}, {pipeline_mode = #tpu.pipeline_mode<synchronous>, transform_indices = @transform_7, window_bounds = array<i64: 1, 32>}, {pipeline_mode = #tpu.pipeline_mode<synchronous>, transform_indices = @transform_8, window_bounds = array<i64: 1, 1>}, {transform_indices = @transform_9, window_bounds = array<i64: 1, 128>}]} {
    %c0 = arith.constant 0 : index
    %c0_0 = arith.constant 0 : index
    %0 = vector.load %arg1[%c0, %c0_0] : memref<5x128xf32, #tpu.memory_space<vmem>>, vector<5x128xf32>
    %c0_1 = arith.constant 0 : index
    %c0_2 = arith.constant 0 : index
    %1 = vector.load %arg2[%c0_1, %c0_2] : memref<32x5xf32, #tpu.memory_space<vmem>>, vector<32x5xf32>
    %cst = arith.constant dense<0.000000e+00> : vector<32x128xf32>
    %2 = tpu.matmul %1, %0, %cst {dimension_numbers = #tpu.dot_dimension_numbers<[1], [0], [0], [1], [0, 0, 1, 1], [], []>} : vector<32x5xf32>, vector<5x128xf32>, vector<32x128xf32> -> vector<32x128xf32>
    %c0_3 = arith.constant 0 : index
    %c0_4 = arith.constant 0 : index
    %3 = vector.load %arg3[%c0_3, %c0_4] : memref<32x1xf32, #tpu.memory_space<vmem>>, vector<32x1xf32>
    %4 = vector.broadcast %3 : vector<32x1xf32> to vector<32x128xf32>
    %5 = arith.addf %2, %4 : vector<32x128xf32>
    %c0_5 = arith.constant 0 : index
    %c0_6 = arith.constant 0 : index
    %6 = vector.load %arg4[%c0_5, %c0_6] : memref<32x1xf32, #tpu.memory_space<vmem>>, vector<32x1xf32>
    %7 = vector.broadcast %6 : vector<32x1xf32> to vector<32x128xf32>
    %8 = arith.mulf %7, %5 : vector<32x128xf32>
    %9 = arith.negf %8 : vector<32x128xf32>
    %10 = math.exp %9 : vector<32x128xf32>
    %cst_7 = arith.constant 1.000000e+00 : f32
    %11 = vector.broadcast %cst_7 : f32 to vector<32x128xf32>
    %12 = arith.addf %11, %10 : vector<32x128xf32>
    %13 = arith.divf %11, %12 : vector<32x128xf32>
    %14 = arith.mulf %5, %13 : vector<32x128xf32>
    %c0_8 = arith.constant 0 : index
    %c0_9 = arith.constant 0 : index
    %15 = vector.load %arg5[%c0_8, %c0_9] : memref<32x32xf32, #tpu.memory_space<vmem>>, vector<32x32xf32>
    %cst_10 = arith.constant dense<0.000000e+00> : vector<32x128xf32>
    %16 = tpu.matmul %15, %14, %cst_10 {dimension_numbers = #tpu.dot_dimension_numbers<[1], [0], [0], [1], [0, 0, 1, 1], [], []>} : vector<32x32xf32>, vector<32x128xf32>, vector<32x128xf32> -> vector<32x128xf32>
    %c0_11 = arith.constant 0 : index
    %c0_12 = arith.constant 0 : index
    %17 = vector.load %arg6[%c0_11, %c0_12] : memref<32x1xf32, #tpu.memory_space<vmem>>, vector<32x1xf32>
    %18 = vector.broadcast %17 : vector<32x1xf32> to vector<32x128xf32>
    %19 = arith.addf %16, %18 : vector<32x128xf32>
    %c0_13 = arith.constant 0 : index
    %c0_14 = arith.constant 0 : index
    %20 = vector.load %arg7[%c0_13, %c0_14] : memref<32x1xf32, #tpu.memory_space<vmem>>, vector<32x1xf32>
    %21 = vector.broadcast %20 : vector<32x1xf32> to vector<32x128xf32>
    %22 = arith.mulf %21, %19 : vector<32x128xf32>
    %23 = arith.negf %22 : vector<32x128xf32>
    %24 = math.exp %23 : vector<32x128xf32>
    %cst_15 = arith.constant 1.000000e+00 : f32
    %25 = vector.broadcast %cst_15 : f32 to vector<32x128xf32>
    %26 = arith.addf %25, %24 : vector<32x128xf32>
    %27 = arith.divf %25, %26 : vector<32x128xf32>
    %28 = arith.mulf %19, %27 : vector<32x128xf32>
    %c0_16 = arith.constant 0 : index
    %c0_17 = arith.constant 0 : index
    %29 = vector.load %arg8[%c0_16, %c0_17] : memref<1x32xf32, #tpu.memory_space<vmem>>, vector<1x32xf32>
    %cst_18 = arith.constant dense<0.000000e+00> : vector<1x128xf32>
    %30 = tpu.matmul %29, %28, %cst_18 {dimension_numbers = #tpu.dot_dimension_numbers<[1], [0], [0], [1], [0, 0, 1, 1], [], []>} : vector<1x32xf32>, vector<32x128xf32>, vector<1x128xf32> -> vector<1x128xf32>
    %c0_19 = arith.constant 0 : index
    %c0_20 = arith.constant 0 : index
    %31 = vector.load %arg9[%c0_19, %c0_20] : memref<1x1xf32, #tpu.memory_space<vmem>>, vector<1x1xf32>
    %32 = vector.broadcast %31 : vector<1x1xf32> to vector<1x128xf32>
    %33 = arith.addf %30, %32 : vector<1x128xf32>
    %c0_21 = arith.constant 0 : index
    %c0_22 = arith.constant 0 : index
    %34 = vector.load %arg10[%c0_21, %c0_22] : memref<1x128xf32, #tpu.memory_space<vmem>>, vector<1x128xf32>
    tpu.vector_store %arg10[%c0_21, %c0_22], %33 {strides = array<i32>} : memref<1x128xf32, #tpu.memory_space<vmem>>, vector<1x128xf32>,
    return
  }
  func.func @transform_0(%arg0: i32) -> (i32, i32) {
    %c0_i32 = arith.constant 0 : i32
    %c0_i32_0 = arith.constant 0 : i32
    return %c0_i32, %arg0 : i32, i32
  }
  func.func @transform_1(%arg0: i32) -> (i32, i32) {
    %c0_i32 = arith.constant 0 : i32
    %c0_i32_0 = arith.constant 0 : i32
    %c0_i32_1 = arith.constant 0 : i32
    return %c0_i32, %c0_i32_0 : i32, i32
  }
  func.func @transform_2(%arg0: i32) -> (i32, i32) {
    %c0_i32 = arith.constant 0 : i32
    %c0_i32_0 = arith.constant 0 : i32
    %c0_i32_1 = arith.constant 0 : i32
    return %c0_i32, %c0_i32_0 : i32, i32
  }
  func.func @transform_3(%arg0: i32) -> (i32, i32) {
    %c0_i32 = arith.constant 0 : i32
    %c0_i32_0 = arith.constant 0 : i32
    %c0_i32_1 = arith.constant 0 : i32
    return %c0_i32, %c0_i32_0 : i32, i32
  }
  func.func @transform_4(%arg0: i32) -> (i32, i32) {
    %c0_i32 = arith.constant 0 : i32
    %c0_i32_0 = arith.constant 0 : i32
    %c0_i32_1 = arith.constant 0 : i32
    return %c0_i32, %c0_i32_0 : i32, i32
  }
  func.func @transform_5(%arg0: i32) -> (i32, i32) {
    %c0_i32 = arith.constant 0 : i32
    %c0_i32_0 = arith.constant 0 : i32
    %c0_i32_1 = arith.constant 0 : i32
    return %c0_i32, %c0_i32_0 : i32, i32
  }
  func.func @transform_6(%arg0: i32) -> (i32, i32) {
    %c0_i32 = arith.constant 0 : i32
    %c0_i32_0 = arith.constant 0 : i32
    %c0_i32_1 = arith.constant 0 : i32
    return %c0_i32, %c0_i32_0 : i32, i32
  }
  func.func @transform_7(%arg0: i32) -> (i32, i32) {
    %c0_i32 = arith.constant 0 : i32
    %c0_i32_0 = arith.constant 0 : i32
    %c0_i32_1 = arith.constant 0 : i32
    return %c0_i32, %c0_i32_0 : i32, i32
  }
  func.func @transform_8(%arg0: i32) -> (i32, i32) {
    %c0_i32 = arith.constant 0 : i32
    %c0_i32_0 = arith.constant 0 : i32
    %c0_i32_1 = arith.constant 0 : i32
    return %c0_i32, %c0_i32_0 : i32, i32
  }
  func.func @transform_9(%arg0: i32) -> (i32, i32) {
    %c0_i32 = arith.constant 0 : i32
    %c0_i32_0 = arith.constant 0 : i32
    return %c0_i32, %arg0 : i32, i32
  }
}

</mosaic_0001>

<bundles_post_ra>
// kernel: tpu_custom_call.1
= control target key start
LH: loop header
LB: loop body
LE: loop exit
PB: predicated region body
PF: predicated region fallthrough
CT: control target
= control target key end

     0   :  { %s1300_s0 = inlined_call_operand.vmem [shape: f32[5,256], index: 0, kind: input, shape index: {}]   ;;  %s1301_s1 = inlined_call_operand.vmem [shape: f32[32,5], index: 1, kind: input, shape index: {}]   ;;  %s1302_s2 = inlined_call_operand.vmem [shape: f32[32,1], index: 2, kind: input, shape index: {}]   ;;  %s1303_s3 = inlined_call_operand.vmem [shape: f32[32,1], index: 3, kind: input, shape index: {}]   ;;  %s1304_s4 = inlined_call_operand.vmem [shape: f32[32,32], index: 4, kind: input, shape index: {}]   ;;  %s1305_s5 = inlined_call_operand.vmem [shape: f32[32,1], index: 5, kind: input, shape index: {}]   ;;  %s1306_s6 = inlined_call_operand.vmem [shape: f32[32,1], index: 6, kind: input, shape index: {}]   ;;  %s1307_s7 = inlined_call_operand.vmem [shape: f32[1,32], index: 7, kind: input, shape index: {}]   ;;  %s1308_s8 = inlined_call_operand.<no memory space> [shape: f32[1,1], index: 8, kind: input, shape index: {}]   ;;  %s1309_s9 = inlined_call_operand.hbm [shape: f32[1,256], index: 9, kind: output, shape index: {}]  }
   0x1   :  { %v14_v0 = vstv %s1308_s8 }
   0x2   :  { %15 = vst [vmem:[#allocation2] sm:$0x1] %v14_v0 }
   0x3   :  { %16 = vsyncpa [#allocation4], 0 }
   0x4   :  { %18 = vsyncpa [#allocation4 + $0x1], 0  ;;  %s1123_s11 = smov 0   ;;  %s1125_s12 = smov 0  }
   0x5   :  { %s1127_s13 = smov 0   ;;  %s1129_s14 = smov 0  }
   0x6 LB: > { %s1144_s8 = sadd.s32 4294967295, %s1064_s14   ;;  %s851_s15 = sadd.s32 4294967294, %s1064_s14   ;;  %s1064_s14 = sphi %s1129_s14, %s1315_s14   ;;  %s1060_s13 = sphi %s1127_s13, %s1314_s13   ;;  %s1056_s12 = sphi %s1125_s12, %s1313_s12   ;;  %s1052_s11 = sphi %s1123_s11, %s1312_s11  }
   0x7   : > { %s1148_s16 = sadd.s32 1, %s1064_s14   ;;  %s225_s17 = sadd.s32 1, %s1060_s13 }
   0x8   : > { %s222_s18 = ssub.s32 %s1064_s14, %s1148_s16  ;;  %p235_p0 = scmp.ne.s32.totalorder %s1060_s13, %s1056_s12 }
   0x9   : > { %p223_p1 = scmp.eq.s32.totalorder %s222_s18, 0  ;;  %p236_p2 = scmp.eq.s32.totalorder %s1144_s8, 1 }
   0xa   : > { %p241_p3 = scmp.ne.s32.totalorder %s1056_s12, %s1052_s11  ;;  %p242_p4 = scmp.eq.s32.totalorder %s851_s15, 1 }
   0xb   : > { %s1159_s19 = scalar_select %p223_p1, %s1060_s13, %s225_s17  }
   0xc   : > { %p1161_p5 = por %p236_p2, %p235_p0  ;;  %p1165_p6 = por %p242_p4, %p241_p3 }
   0xd   : > { %p854_p7 = scmp.ge.s32.totalorder %s1064_s14, 1  ;;  %p291_p8 = scmp.lt.s32.totalorder %s1064_s14, 3 }
   0xf   : > { %p292_p9 = pnand %p854_p7, %p291_p8 }
  0x10   : > { %p325_p10 = scmp.lt.s32.totalorder (!%p292_p9), %s1144_s8, 1  ;;  %s323_s25 = sand.u32 (!%p292_p9), 1, %s1056_s12  }
  0x11   : > { %295 = sbr.rel (%p292_p9) target bundleno = 722 (0x2d2), region = 56  ;;  %s324_s27 = scalar_lea.vmem (!%p292_p9), [#allocation3], %s323_s25 }
  0x12   : > { %s796_s28 = sshll.u32 (!%p292_p9), %s324_s27, 4  ;;  %s784_s15 = scalar_lea.sflag (!%p292_p9), [#allocation4], %s323_s25  ;;  %s797_s28 = int_to_ptr.vmem [resolvable:$true] %s796_s28 }
  0x13   : > { %s1004_s17 = scalar_lea.vmem (!%p292_p9), %s797_s28, 16 }
  0x14   : > { %p1005_p11 = scmp.ne.s32.totalorder (!%p292_p9), %s797_s28, %s1004_s17 }
  0x16   : > { %v330_v1 = vld [vmem:[%s1301_s1] sm:$0xff]  ;;  %vm358_vm0 = vcmask 39936   ;;  %v337_v2 = vld [vmem:[%s1302_s2 + $0x18] sm:$0xff]  ;;  %s326_s26 = scalar_select %p325_p10, %s1144_s8, 1  ;;  %v1066_v3 = vmov 0   ;;  %vm371_vm1 = vcmask 1044480  }
  0x17   : > { %897 = vmatprep.mubr.msk.f32.mxu0 %vm358_vm0, %v330_v1  ;;  %970 = vset.pattern.permute.xlu0 %v1066_v3  ;;  %v463_v4 = vld [vmem:[%s1303_s3 + $0x18] sm:$0xff]  ;;  %v336_v5 = vld [vmem:[%s1302_s2 + $0x10] sm:$0xff]  ;;  %v335_v6 = vld [vmem:[%s1302_s2 + $0x8] sm:$0xff]  ;;  %vm544_vm2 = vcmask 261120   ;;  %vm1068_vm3 = vmmov 0   ;;  %p1006_p12 = pnand %p1005_p11, %p1161_p5 }
  0x18   : > { %971 = vset.pattern.permute.xlu1 %v1066_v3  ;;  %355 = vperm.xlu0 %970, %v337_v2   ;;  %s855_s29 = sshll.u32 %s326_s26, 3  ;;  %v331_v8 = vld [vmem:[%s1301_s1 + $0x8] sm:$0xff]  ;;  %v332_v9 = vld [vmem:[%s1301_s1 + $0x10] sm:$0xff]  ;;  %v334_v11 = vld [vmem:[%s1302_s2] sm:$0xff]  ;;  %s874_s26 = sshll.u32 %s1144_s8, 4 }
  0x19   : > { %481 = vperm.xlu1 %971, %v463_v4   ;;  %s328_s18 = scalar_lea.vmem %s1300_s0, %s855_s29  ;;  %v462_v10 = vld [vmem:[%s1303_s3 + $0x10] sm:$0xff]  ;;  %v333_v12 = vld [vmem:[%s1301_s1 + $0x18] sm:$0xff]  ;;  %v461_v13 = vld [vmem:[%s1303_s3 + $0x8] sm:$0xff]  ;;  %v1067_v4 = vmov 0.0   ;;  %s1265_s10 = scalar_lea.hbm %s1309_s9, %s874_s26 }
  0x1a   : > { %v329_v7 = vld [vmem:[%s328_s18] sm:$0x1f]  ;;  %v523_v15 = vld [vmem:[%s1305_s5 + $0x18] sm:$0xff]  ;;  %v522_v16 = vld [vmem:[%s1305_s5 + $0x10] sm:$0xff]  ;;  %p1007_p13 = pneg %p1006_p12  ;;  %s1069_s8 = smov [#allocation3]  }
  0x1b   : > { %895 = vmatprep.subr.msk.mxu0 %vm371_vm1, %v329_v7  ;;  %v460_v14 = vld [vmem:[%s1303_s3] sm:$0xff]  ;;  %v645_v17 = vld [vmem:[%s1306_s6 + $0x18] sm:$0xff]  ;;  %v521_v18 = vld [vmem:[%s1305_s5 + $0x8] sm:$0xff]  ;;  %s1008_s18 = sshll.u32 %s1069_s8, 4  ;;  %s1009_s18 = int_to_ptr.vmem [resolvable:$false] %s1008_s18 }
  0x1c   : > { %350 = vperm.xlu0 %970, %v336_v5   ;;  %896 = vmatpush3.msk.msra.mxu0 %vm371_vm1, %v329_v7  ;;  %v644_v19 = vld [vmem:[%s1306_s6 + $0x10] sm:$0xff]  ;;  %v520_v20 = vld [vmem:[%s1305_s5] sm:$0xff]  ;;  %v643_v21 = vld [vmem:[%s1306_s6 + $0x8] sm:$0xff]  ;;  %s1010_s22 = scalar_lea.vmem %s1009_s18, 32  ;;  %p1011_p0 = scmp.lt.s32.totalorder %s797_s28, %s1009_s18 }
  0x1d   : > { %345 = vperm.xlu1 %971, %v335_v6   ;;  %898 = vmatmul.mubr.msk.f32.vlgmr.msra.gmra.mxu0 %vm358_vm0, %v331_v8  ;;  %v642_v22 = vld [vmem:[%s1306_s6] sm:$0xff]  ;;  %v517_v1 = vld [vmem:[%s1304_s4 + $0x8] sm:$0xff]  ;;  %v518_v2 = vld [vmem:[%s1304_s4 + $0x10] sm:$0xff]  ;;  %p1012_p1 = scmp.lt.s32.totalorder %s1010_s22, %s1004_s17 }
  0x1e   : > { %900 = vmatprep.mubr.msk.f32.mxu0 %vm358_vm0, %v332_v9  ;;  %v699_v23 = vld [vmem:[#allocation2] sm:$0x1]  ;;  %v519_v3 = vld [vmem:[%s1304_s4 + $0x18] sm:$0xff]  ;;  %917 = vmatprep.subr.mxu0 %v1067_v4 }
  0x1f   : > { %v516_v24 = vld [vmem:[%s1304_s4] sm:$0xff]  ;;  %p1013_p2 = por %p1012_p1, %p1011_p0 }
  0x20   : > { %476 = vperm.xlu0 %970, %v462_v10   ;;  %911 = vmatprep.mubr.msk.f32.mxu1 %vm544_vm2, %v516_v24 }
  0x21   : > { %340 = vperm.xlu1 %971, %v334_v11   ;;  %901 = vmatmul.mubr.msk.f32.gmra.mxu0 %vm358_vm0, %v333_v12  ;;  %p1014_p3 = pnand %p1013_p2, %p1007_p13 }
  0x22   : > { %925 = vmatprep.mubr.msk.f32.mxu0 %vm1068_vm3, %v1067_v4 }
  0x24   : > { %471 = vperm.xlu0 %970, %v461_v13  }
  0x25   : > { %466 = vperm.xlu1 %971, %v460_v14  }
  0x28   : > { %541 = vperm.xlu0 %970, %v523_v15  }
  0x29   : > { %536 = vperm.xlu1 %971, %v522_v16  }
  0x2c   : > { %663 = vperm.xlu0 %970, %v645_v17  }
  0x2d   : > { %531 = vperm.xlu1 %971, %v521_v18  }
  0x30   : > { %658 = vperm.xlu0 %970, %v644_v19  }
  0x31   : > { %526 = vperm.xlu1 %971, %v520_v20  }
  0x34   : > { %653 = vperm.xlu0 %970, %v643_v21  }
  0x35   : > { %648 = vperm.xlu1 %971, %v642_v22  }
  0x38   : > { %702 = vperm.xlu0 %970, %v699_v23  }
  0x93   : > { %v356_v25 = vpop.permute.xlu0 %355 }
  0x94   : > { %v482_v26 = vpop.permute.xlu1 %481 }
  0x97   : > { %v351_v27 = vpop.permute.xlu0 %350 }
  0x98   : > { %v346_v28 = vpop.permute.xlu1 %345 }
  0x9b   : > { %v477_v29 = vpop.permute.xlu0 %476 }
  0x9c   : > { %v341_v30 = vpop.permute.xlu1 %340 }
  0x9f   : > { %v472_v33 = vpop.permute.xlu0 %471 }
  0xa0   : > { %v467_v37 = vpop.permute.xlu1 %466 }
  0xa3   : > { %v542_v5 = vpop.permute.xlu0 %541 }
  0xa4   : > { %v537_v6 = vpop.permute.xlu1 %536 }
  0xa7   : > { %v664_v7 = vpop.permute.xlu0 %663 }
  0xa8   : > { %v532_v8 = vpop.permute.xlu1 %531 }
  0xab   : > { %v659_v9 = vpop.permute.xlu0 %658 }
  0xac   : > { %v527_v10 = vpop.permute.xlu1 %526 }
  0xaf   : > { %v654_v13 = vpop.permute.xlu0 %653 }
  0xb0   : > { %v649_v17 = vpop.permute.xlu1 %648 }
  0xdd   : > { %v899_v31 = vpop.f32.mrf.mxu0 }
  0xde   : > { %v447_v32 = vadd.f32 %v899_v31, %v346_v28 }
  0xdf   : > { %v441_v34 = vpop.f32.mrf.mxu0 }
  0xe0   : > { %v485_v35 = vmul.f32 %v472_v33, %v447_v32  ;;  %v442_v36 = vadd.f32 %v441_v34, %v341_v30 }
  0xe1   : > { %v902_v38 = vpop.f32.mrf.mxu0 }
  0xe2   : > { %v862_v39 = vmul.f32 -1.442695, %v485_v35  ;;  %v484_v40 = vmul.f32 %v467_v37, %v442_v36  ;;  %v457_v41 = vadd.f32 %v902_v38, %v356_v25 }
  0xe3   : > { %v451_v42 = vpop.f32.mrf.mxu0 }
  0xe4   : > { %v861_v43 = vmul.f32 -1.442695, %v484_v40  ;;  %v487_v44 = vmul.f32 %v482_v26, %v457_v41  ;;  %v452_v45 = vadd.f32 %v451_v42, %v351_v27  ;;  %972 = vpow2.f32 %v862_v39 }
  0xe6   : > { %v864_v46 = vmul.f32 -1.442695, %v487_v44  ;;  %v486_v47 = vmul.f32 %v477_v29, %v452_v45  ;;  %974 = vpow2.f32 %v861_v43 }
  0xe8   : > { %976 = vpow2.f32 %v864_v46  ;;  %v863_v48 = vmul.f32 -1.442695, %v486_v47  ;;  %v705_v46 = vlaneseq }
  0xea   : > { %978 = vpow2.f32 %v863_v48  ;;  %v706_v47 = vshrl.u32 %v705_v46, 7 }
  0xec   : > { %v707_v48 = vsub.s32 0, %v706_v47 }
  0xf1   : > { %v973_v49 = vpop.eup %972 }
  0xf2   : > { %v501_v52 = vadd.f32 1.0, %v973_v49  ;;  %v703_v49 = vpop.permute.xlu0 %702 }
  0xf3   : > { %v975_v50 = vpop.eup %974 }
  0xf4   : > { %v500_v55 = vadd.f32 1.0, %v975_v50  ;;  %v708_v50 = vrot.slane %v703_v49, %v707_v48 }
  0xf5   : > { %v977_v51 = vpop.eup %976 }
  0xf6   : > { %v503_v53 = vadd.f32 1.0, %v977_v51 }
  0xf7   : > { %v979_v54 = vpop.eup %978 }
  0xf8   : > { %980 = vrcp.f32 %v503_v53  ;;  %v502_v56 = vadd.f32 1.0, %v979_v54 }
  0xf9   : > { %982 = vrcp.f32 %v501_v52 }
  0xfa   : > { %984 = vrcp.f32 %v502_v56 }
  0xfb   : > { %986 = vrcp.f32 %v500_v55 }
 0x105   : > { %v981_v57 = vpop.eup %980 }
 0x106   : > { %v983_v58 = vpop.eup %982  ;;  %v515_v59 = vmul.f32 %v981_v57, %v457_v41 }
 0x107   : > { %v985_v60 = vpop.eup %984  ;;  %v513_v63 = vmul.f32 %v983_v58, %v447_v32 }
 0x108   : > { %v514_v61 = vmul.f32 %v985_v60, %v452_v45  ;;  %903 = vmatprep.subr.mxu1 %v515_v59  ;;  %v987_v62 = vpop.eup %986  ;;  %v698_v45 = vld [vmem:[%s1307_s7] sm:$0x1] }
 0x109   : > { %904 = vmatpush3.msra.mxu1 %v515_v59  ;;  %v512_v0 = vmul.f32 %v987_v62, %v442_v36 }
 0x10a   : > { %905 = vmatprep.subr.mxu1 %v514_v61 }
 0x10b   : > { %906 = vmatpush3.msra.mxu1 %v514_v61 }
 0x10c   : > { %907 = vmatprep.subr.mxu1 %v513_v63 }
 0x10d   : > { %908 = vmatpush3.msra.mxu1 %v513_v63 }
 0x10e   : > { %909 = vmatprep.subr.mxu1 %v512_v0 }
 0x10f   : > { %910 = vmatpush3.msra.mxu1 %v512_v0 }
 0x110   : > { %912 = vmatmul.mubr.msk.f32.vlgmr.msra.gmra.mxu1 %vm544_vm2, %v517_v1 }
 0x111   : > { %914 = vmatprep.mubr.msk.f32.mxu1 %vm544_vm2, %v518_v2 }
 0x114   : > { %915 = vmatmul.mubr.msk.f32.gmra.mxu1 %vm544_vm2, %v519_v3 }
 0x1d0   : > { %v913_v11 = vpop.f32.mrf.mxu1 }
 0x1d1   : > { %v629_v12 = vadd.f32 %v913_v11, %v532_v8 }
 0x1d2   : > { %v623_v14 = vpop.f32.mrf.mxu1 }
 0x1d3   : > { %v667_v15 = vmul.f32 %v654_v13, %v629_v12  ;;  %v624_v16 = vadd.f32 %v623_v14, %v527_v10 }
 0x1d4   : > { %v916_v18 = vpop.f32.mrf.mxu1 }
 0x1d5   : > { %v870_v19 = vmul.f32 -1.442695, %v667_v15  ;;  %v666_v20 = vmul.f32 %v649_v17, %v624_v16  ;;  %v639_v21 = vadd.f32 %v916_v18, %v542_v5 }
 0x1d6   : > { %v633_v22 = vpop.f32.mrf.mxu1 }
 0x1d7   : > { %v869_v23 = vmul.f32 -1.442695, %v666_v20  ;;  %v669_v24 = vmul.f32 %v664_v7, %v639_v21  ;;  %v634_v25 = vadd.f32 %v633_v22, %v537_v6  ;;  %988 = vpow2.f32 %v870_v19 }
 0x1d9   : > { %v872_v26 = vmul.f32 -1.442695, %v669_v24  ;;  %v668_v27 = vmul.f32 %v659_v9, %v634_v25  ;;  %990 = vpow2.f32 %v869_v23 }
 0x1db   : > { %992 = vpow2.f32 %v872_v26  ;;  %v871_v28 = vmul.f32 -1.442695, %v668_v27 }
 0x1dd   : > { %994 = vpow2.f32 %v871_v28 }
 0x1e4   : > { %v989_v29 = vpop.eup %988 }
 0x1e5   : > { %v683_v32 = vadd.f32 1.0, %v989_v29 }
 0x1e6   : > { %v991_v30 = vpop.eup %990 }
 0x1e7   : > { %v682_v35 = vadd.f32 1.0, %v991_v30 }
 0x1e8   : > { %v993_v31 = vpop.eup %992 }
 0x1e9   : > { %v685_v33 = vadd.f32 1.0, %v993_v31 }
 0x1ea   : > { %v995_v34 = vpop.eup %994 }
 0x1eb   : > { %996 = vrcp.f32 %v685_v33  ;;  %v684_v36 = vadd.f32 1.0, %v995_v34 }
 0x1ec   : > { %998 = vrcp.f32 %v683_v32 }
 0x1ed   : > { %1000 = vrcp.f32 %v684_v36 }
 0x1ee   : > { %1002 = vrcp.f32 %v682_v35 }
 0x1f8   : > { %v997_v37 = vpop.eup %996 }
 0x1f9   : > { %v999_v38 = vpop.eup %998  ;;  %v697_v39 = vmul.f32 %v997_v37, %v639_v21 }
 0x1fa   : > { %v1001_v40 = vpop.eup %1000  ;;  %v695_v43 = vmul.f32 %v999_v38, %v629_v12 }
 0x1fb   : > { %v696_v41 = vmul.f32 %v1001_v40, %v634_v25  ;;  %918 = vmatpush3.msra.mxu0 %v697_v39  ;;  %v1003_v42 = vpop.eup %1002 }
 0x1fc   : > { %919 = vmatprep.subr.mxu0 %v1067_v4  ;;  %v694_v44 = vmul.f32 %v1003_v42, %v624_v16 }
 0x1fd   : > { %920 = vmatpush3.msra.mxu0 %v696_v41 }
 0x1fe   : > { %921 = vmatprep.subr.mxu0 %v1067_v4 }
 0x1ff   : > { %922 = vmatpush3.msra.mxu0 %v695_v43 }
 0x200   : > { %923 = vmatprep.subr.mxu0 %v1067_v4 }
 0x201   : > { %924 = vmatpush3.msra.mxu0 %v694_v44 }
 0x202   : > { %926 = vmatmul.mubr.msk.f32.vlgmr.msra.gmra.mxu0 %vm544_vm2, %v698_v45 }
 0x2c2   : > { %v778_v51 = vpop.f32.mrf.mxu0 }
 0x2c3   : > { %v779_v52 = vadd.f32 %v778_v51, %v708_v50 }
 0x2c4   : > { %v927_v53 = vpop.f32.mrf.mxu0 }
 0x2c5   : > { %782 = vst [vmem:[%s324_s27] sm:$0x1] %v779_v52 }
 0x2c6   : > { %1017 = shalt.err (!%p1014_p3)
}
 0x2c7   : > { %s1018_s23 = scalar_lea.hbm %s1265_s10, 16  ;;  %s1022_s26 = scalar_lea.hbm %s1309_s9, 32 }
 0x2c8   : > { %p1019_p4 = scmp.ne.s32.totalorder %s1265_s10, %s1018_s23  ;;  %p1023_p9 = scmp.lt.s32.totalorder %s1265_s10, %s1309_s9 }
 0x2c9   : > { %p1024_p10 = scmp.lt.s32.totalorder %s1022_s26, %s1018_s23 }
 0x2ca   : > { %p1020_p7 = pnand %p1019_p4, %p1161_p5 }
 0x2cb   : > { %p1025_p11 = por %p1024_p10, %p1023_p9 }
 0x2cc   : > { %p1021_p8 = pneg %p1020_p7 }
 0x2ce   : > { %p1026_p12 = pnand %p1025_p11, %p1021_p8 }
 0x2d0   : > { %1029 = shalt.err (!%p1026_p12)
}
 0x2d1   : > { %928 = dma.vmem_to_hbm [thread:$0]  (%p1161_p5), %s797_s28, 16, %s1265_s10, %s784_s15  }
 0x2d2 PF: > { %p934_p13 = scmp.ge.s32.totalorder %s1064_s14, 2  ;;  %s808_s29 = sand.u32 1, %s1052_s11  }
 0x2d3   : > { %s809_s17 = scalar_lea.sflag [#allocation4], %s808_s29 }
 0x2d4   : > { %p931_p0 = pnand %p934_p13, %p1165_p6 }
 0x2d6   : > { %p932_p1 = pneg %p931_p0 }
 0x2d8   : > { %1047 = dma.done.wait (%p932_p1), %s809_s17, 16  }
 0x2d9   : > { %1049 = vsyncadd (%p932_p1), %s809_s17, 4294967280  ;;  %p21_p2 = scmp.ge.s32.totalorder %s1148_s16, 4   ;;  %s1312_s11 = smov %s1056_s12 }
 0x2da   : > { %s1313_s12 = smov %s1060_s13  ;;  %s1314_s13 = smov %s1159_s19 }
 0x2db   : > { %s1315_s14 = smov %s1148_s16  ;;  %23 = sbr.rel (!%p21_p2) target bundleno = 6 (0x6), region = 91 }
 0x2e0   :  { %813 = vsyncpa [#allocation4], 1 }
 0x2e1   :  { %815 = vsyncpa [#allocation4 + $0x1], 1 }

</bundles_post_ra>
